<compile_context>
chip_gen: v7x
topology: tpu7x:2x2x1
jax: 0.10.0
libtpu: 0.0.40
codegen_flags: <defaults>
</compile_context>

<pallas_src>
import functools

import jax
import jax.numpy as jnp
from jax.experimental import pallas as pl
from jax.experimental.pallas import tpu as pltpu

_NEG = -1e30          # masked-patch fill value (Python float -> literal)
_NEG_INF = float("-inf")


# ----------------------------- Pallas kernel -----------------------------
def _mil_router_kernel(x_ref, mask_ref,
                       vt_ref, vb_ref, w_ref, wb_ref,
                       cwt_ref, cb_ref,
                       probs_ref, logits_ref,
                       m_sc, l_sc, acc_sc,
                       *, inv_temp: float, n_total: int):
    """One (bag b, patch-tile n) grid step of the ABMIL gate + router head."""
    n = pl.program_id(1)

    # ---- init running stats at the first patch tile of this bag ----
    @pl.when(n == 0)
    def _init():
        m_sc[...] = jnp.full(m_sc.shape, _NEG, jnp.float32)
        l_sc[...] = jnp.zeros(l_sc.shape, jnp.float32)
        acc_sc[...] = jnp.zeros(acc_sc.shape, jnp.float32)

    x = x_ref[...]                        # (TN, D), kept in input dtype
    msk = mask_ref[...]                   # (TN, 1), float {0, 1}
    tn = x.shape[0]

    # ---- attention MLP: h = tanh(x @ V^T + vb) on the MXU (f32 acc) ----
    h = jnp.tanh(
        jnp.dot(x, vt_ref[...], preferred_element_type=jnp.float32)
        + vb_ref[...])                    # (TN, L) f32

    # ---- score = h @ w^T + wb  as VPU multiply + lane(L) reduction ----
    s = jnp.sum(h * w_ref[...], axis=-1, keepdims=True) + wb_ref[0, 0]  # (TN,1)

    # ---- masking: user mask -> -1e30 (same as reference); rows past N
    #      (ragged last-tile padding) -> -inf so they never contribute.
    #      NOTE: a fully-masked bag degenerates to a uniform average over its
    #      N real patches, identical to the monolithic / PyTorch behavior. ----
    row = jax.lax.broadcasted_iota(jnp.int32, s.shape, 0) + n * tn
    s = jnp.where(msk > 0.0, s, _NEG)
    s = jnp.where(row < n_total, s, _NEG_INF)

    # ---- online (flash-style) softmax over the patch axis ----
    m_old = m_sc[...]                                              # (1, 1)
    m_new = jnp.maximum(m_old, jnp.max(s, axis=0, keepdims=True))  # (1, 1)
    corr = jnp.exp(m_old - m_new)
    p = jnp.exp(s - m_new)                                         # (TN, 1)
    l_sc[...] = corr * l_sc[...] + jnp.sum(p, axis=0, keepdims=True)
    # pooled accumulator on the MXU:  p^T (1, TN) @ x (TN, D)
    pz = jax.lax.dot_general(
        p.astype(x.dtype), x,
        dimension_numbers=(((0,), (0,)), ((), ())),
        preferred_element_type=jnp.float32)                        # (1, D)
    acc_sc[...] = corr * acc_sc[...] + pz
    m_sc[...] = m_new

    # ---- last patch tile: classifier head + expert softmax ----
    @pl.when(n == pl.num_programs(1) - 1)
    def _finalize():
        inv_l = pl.reciprocal(l_sc[...], approx=True)              # (1,1) EUP
        z = acc_sc[...] * inv_l                                    # (1, D) f32
        logits = (jnp.dot(z, cwt_ref[...],
                          preferred_element_type=jnp.float32)
                  + cb_ref[...])                                   # (1, E)
        scaled = logits * inv_temp                                 # /T folded
        mx = jnp.max(scaled, axis=-1, keepdims=True)
        ex = jnp.exp(scaled - mx)
        probs = ex / jnp.sum(ex, axis=-1, keepdims=True)           # exact norm
        logits_ref[...] = logits.astype(logits_ref.dtype)
        probs_ref[...] = probs.astype(probs_ref.dtype)


# ------------------------------- wrapper ---------------------------------
def mil_router_forward(x, mask, params, temperature: float = 1.0, tile_n=None):
    """x: (B, N, D); mask: (B, N, 1) with 1 = keep.  Returns (probs, logits)."""
    B, N, D = x.shape
    L = params['att_v'].shape[0]
    E = params['cls_w'].shape[0]

    # Patch-tile size: multiple of 8 sublanes; the default 512-row cap keeps
    # double-buffered (TN, D) tiles well inside the explicit 32 MiB VMEM
    # budget on every generation (v5e / v6e / v7x).
    if tile_n is None:
        tile_n = min(512, ((N + 7) // 8) * 8)
    num_n = (N + tile_n - 1) // tile_n

    # Contraction-major (pre-transposed) weights -> no in-kernel transposes.
    # The big attention weight follows x's dtype so bf16 x feeds the MXU
    # directly with f32 accumulation; biases / small weights stay f32.
    vt = params['att_v'].T.astype(x.dtype)                    # (D, L)
    vb = params['att_vb'].astype(jnp.float32)                 # (1, L)
    w = params['att_w'].astype(jnp.float32)                   # (1, L)
    wb = params['att_wb'].reshape(1, 1).astype(jnp.float32)   # (1, 1) scalar
    cwt = params['cls_w'].T.astype(jnp.float32)               # (D, E)
    cb = params['cls_b'].astype(jnp.float32)                  # (1, E)
    mask = mask.astype(jnp.float32)

    kernel = functools.partial(_mil_router_kernel,
                               inv_temp=float(1.0 / temperature),
                               n_total=int(N))

    const = lambda b, n: (0, 0)   # weights resident across the whole N grid
    grid_spec = pltpu.PrefetchScalarGridSpec(
        num_scalar_prefetch=0,
        grid=(B, num_n),
        in_specs=[
            pl.BlockSpec((None, tile_n, D), lambda b, n: (b, n, 0)),  # x tile
            pl.BlockSpec((None, tile_n, 1), lambda b, n: (b, n, 0)),  # mask
            pl.BlockSpec((D, L), const),                              # V^T
            pl.BlockSpec((1, L), const),                              # v_b
            pl.BlockSpec((1, L), const),                              # w
            pl.BlockSpec(memory_space=pltpu.MemorySpace.SMEM),        # w_b
            pl.BlockSpec((D, E), const),                              # Wc^T
            pl.BlockSpec((1, E), const),                              # c_b
        ],
        out_specs=[
            pl.BlockSpec((None, 1, E), lambda b, n: (b, 0, 0)),       # probs
            pl.BlockSpec((None, 1, E), lambda b, n: (b, 0, 0)),       # logits
        ],
        scratch_shapes=[
            pltpu.VMEM((1, 1), jnp.float32),   # running max   m
            pltpu.VMEM((1, 1), jnp.float32),   # running denom l
            pltpu.VMEM((1, D), jnp.float32),   # running un-normalized z
        ],
    )

    probs3, logits3 = pl.pallas_call(
        kernel,
        out_shape=(jax.ShapeDtypeStruct((B, 1, E), jnp.float32),
                   jax.ShapeDtypeStruct((B, 1, E), jnp.float32)),
        grid_spec=grid_spec,
        compiler_params=pltpu.CompilerParams(
            dimension_semantics=("parallel", "arbitrary"),
            vmem_limit_bytes=32 * 1024 * 1024,
        ),
    )(x, mask, vt, vb, w, wb, cwt, cb)

    return probs3.reshape(B, E), logits3.reshape(B, E)


# -------------------------- pure-JAX reference ----------------------------
def mil_router_reference(x, mask, params, temperature: float = 1.0):
    hp = dict(precision='highest')
    h = jnp.tanh(jnp.einsum('bnd,ld->bnl', x, params['att_v'], **hp)
                 + params['att_vb'])
    s = jnp.einsum('bnl,ol->bno', h, params['att_w'], **hp) \
        + params['att_wb'][0, 0]
    s = jnp.where(mask > 0, s, -1e30)
    a = jax.nn.softmax(s, axis=1)
    z = jnp.sum(a * x, axis=1)
    logits = jnp.einsum('bd,ed->be', z, params['cls_w'], **hp) + params['cls_b']
    probs = jax.nn.softmax(logits / temperature, axis=1)
    return probs, logits


# -------------------------- deterministic init ----------------------------
def xavier_uniform(key, out_dim, in_dim):
    bound = (6.0 / (in_dim + out_dim)) ** 0.5
    return jax.random.uniform(key, (out_dim, in_dim), jnp.float32, -bound, bound)


def init_params(key, D, L, E):
    k1, k2, k3 = jax.random.split(key, 3)
    return {
        # attention Linear(D -> L)
        'att_v': xavier_uniform(k1, L, D),
        'att_vb': jnp.zeros((1, L), jnp.float32),
        # attention Linear(L -> 1)
        'att_w': xavier_uniform(k2, 1, L),
        'att_wb': jnp.zeros((1, 1), jnp.float32),
        # classifier Linear(D -> E)
        'cls_w': xavier_uniform(k3, E, D),
        'cls_b': jnp.zeros((1, E), jnp.float32),
    }


# --------------------------------- main -----------------------------------
if __name__ == "__main__":
    B, N, D = 2, 24, 32     # batch, patches, combined feature dim
    L, E = 16, 4            # attention hidden dim, number of experts
    temperature = 0.5
    TILE_N = 8              # small tile so the toy shapes exercise the
                            # multi-tile online-softmax path (grid = (2, 3))

    key = jax.random.PRNGKey(0)
    kx, kp = jax.random.split(key)

    x = jax.random.normal(kx, (B, N, D), jnp.float32)
    # mask: first bag uses all N patches, second bag only the first 13
    lengths = jnp.array([N, 13])
    mask = (jnp.arange(N)[None, :] < lengths[:, None]).astype(jnp.float32)[:, :, None]

    params = init_params(kp, D, L, E)

    probs, logits = mil_router_forward(x, mask, params,
                                       temperature=temperature, tile_n=TILE_N)
    jax.block_until_ready((probs, logits))

    probs_ref, logits_ref = mil_router_reference(x, mask, params,
                                                 temperature=temperature)

    assert probs.shape == (B, E) and logits.shape == (B, E)
    # exact-division final normalization -> probs sum to 1 tightly
    assert bool(jnp.all(jnp.abs(jnp.sum(probs, axis=1) - 1.0) < 1e-5))
    # approx reciprocal for 1/l introduces tiny deviations; 2e-2 is far above
    # that and far below any real semantic bug (e.g. ignored mask / tiling).
    assert bool(jnp.allclose(logits, logits_ref, atol=2e-2))
    assert bool(jnp.allclose(probs, probs_ref, atol=2e-2))

    print("KERNEL_OK")
</pallas_src>

<mosaic_0001>
module attributes {stable_mosaic.version = 11 : i64} {
  func.func @_mil_router_kernel(%arg0: i32, %arg1: i32, %arg2: memref<1x8x32xf32, #tpu.memory_space<vmem>>, %arg3: memref<1x8x1xf32, #tpu.memory_space<vmem>>, %arg4: memref<32x16xf32, #tpu.memory_space<vmem>>, %arg5: memref<1x16xf32, #tpu.memory_space<vmem>>, %arg6: memref<1x16xf32, #tpu.memory_space<vmem>>, %arg7: memref<1x1xf32, #tpu.memory_space<smem>>, %arg8: memref<32x4xf32, #tpu.memory_space<vmem>>, %arg9: memref<1x4xf32, #tpu.memory_space<vmem>>, %arg10: memref<1x1x4xf32, #tpu.memory_space<vmem>>, %arg11: memref<1x1x4xf32, #tpu.memory_space<vmem>>, %arg12: memref<1x1xf32, #tpu.memory_space<vmem>>, %arg13: memref<1x1xf32, #tpu.memory_space<vmem>>, %arg14: memref<1x32xf32, #tpu.memory_space<vmem>>) attributes {dimension_semantics = [#tpu.dimension_semantics<parallel>, #tpu.dimension_semantics<arbitrary>], iteration_bounds = array<i64: 2, 3>, scalar_prefetch = 0 : i64, scratch_operands = 3 : i64, tpu.core_type = #tpu.core_type<tc>, window_params = [{transform_indices = @transform_0, window_bounds = array<i64: 1, 8, 32>}, {transform_indices = @transform_1, window_bounds = array<i64: 1, 8, 1>}, {pipeline_mode = #tpu.pipeline_mode<synchronous>, transform_indices = @transform_2, window_bounds = array<i64: 32, 16>}, {pipeline_mode = #tpu.pipeline_mode<synchronous>, transform_indices = @transform_3, window_bounds = array<i64: 1, 16>}, {pipeline_mode = #tpu.pipeline_mode<synchronous>, transform_indices = @transform_4, window_bounds = array<i64: 1, 16>}, {transform_indices = @transform_5, window_bounds = array<i64: 1, 1>}, {pipeline_mode = #tpu.pipeline_mode<synchronous>, transform_indices = @transform_6, window_bounds = array<i64: 32, 4>}, {pipeline_mode = #tpu.pipeline_mode<synchronous>, transform_indices = @transform_7, window_bounds = array<i64: 1, 4>}, {transform_indices = @transform_8, window_bounds = array<i64: 1, 1, 4>}, {transform_indices = @transform_9, window_bounds = array<i64: 1, 1, 4>}]} {
    %c0_i32 = arith.constant 0 : i32
    %0 = arith.cmpi eq, %arg1, %c0_i32 : i32
    %1 = arith.extui %0 : i1 to i32
    %c0_i32_0 = arith.constant 0 : i32
    %2 = arith.cmpi ne, %1, %c0_i32_0 : i32
    scf.if %2 {
      %cst_34 = arith.constant -1.000000e+30 : f32
      %58 = vector.broadcast %cst_34 : f32 to vector<1x1xf32>
      %c0_35 = arith.constant 0 : index
      %c0_36 = arith.constant 0 : index
      %59 = vector.load %arg12[%c0_35, %c0_36] : memref<1x1xf32, #tpu.memory_space<vmem>>, vector<1x1xf32>
      tpu.vector_store %arg12[%c0_35, %c0_36], %58 {strides = array<i32>} : memref<1x1xf32, #tpu.memory_space<vmem>>, vector<1x1xf32>,
      %cst_37 = arith.constant 0.000000e+00 : f32
      %60 = vector.broadcast %cst_37 : f32 to vector<1x1xf32>
      %c0_38 = arith.constant 0 : index
      %c0_39 = arith.constant 0 : index
      %61 = vector.load %arg13[%c0_38, %c0_39] : memref<1x1xf32, #tpu.memory_space<vmem>>, vector<1x1xf32>
      tpu.vector_store %arg13[%c0_38, %c0_39], %60 {strides = array<i32>} : memref<1x1xf32, #tpu.memory_space<vmem>>, vector<1x1xf32>,
      %cst_40 = arith.constant 0.000000e+00 : f32
      %62 = vector.broadcast %cst_40 : f32 to vector<1x32xf32>
      %c0_41 = arith.constant 0 : index
      %c0_42 = arith.constant 0 : index
      %63 = vector.load %arg14[%c0_41, %c0_42] : memref<1x32xf32, #tpu.memory_space<vmem>>, vector<1x32xf32>
      tpu.vector_store %arg14[%c0_41, %c0_42], %62 {strides = array<i32>} : memref<1x32xf32, #tpu.memory_space<vmem>>, vector<1x32xf32>,
    } else {
    }
    %c0 = arith.constant 0 : index
    %c0_1 = arith.constant 0 : index
    %c0_2 = arith.constant 0 : index
    %3 = vector.load %arg2[%c0, %c0_1, %c0_2] : memref<1x8x32xf32, #tpu.memory_space<vmem>>, vector<1x8x32xf32>
    %4 = vector.shape_cast %3 : vector<1x8x32xf32> to vector<8x32xf32>
    %c0_3 = arith.constant 0 : index
    %c0_4 = arith.constant 0 : index
    %c0_5 = arith.constant 0 : index
    %5 = vector.load %arg3[%c0_3, %c0_4, %c0_5] : memref<1x8x1xf32, #tpu.memory_space<vmem>>, vector<1x8x1xf32>
    %6 = vector.shape_cast %5 : vector<1x8x1xf32> to vector<8x1xf32>
    %c0_6 = arith.constant 0 : index
    %c0_7 = arith.constant 0 : index
    %7 = vector.load %arg4[%c0_6, %c0_7] : memref<32x16xf32, #tpu.memory_space<vmem>>, vector<32x16xf32>
    %cst = arith.constant dense<0.000000e+00> : vector<8x16xf32>
    %8 = tpu.matmul %4, %7, %cst {dimension_numbers = #tpu.dot_dimension_numbers<[1], [0], [0], [1], [0, 0, 1, 1], [], []>} : vector<8x32xf32>, vector<32x16xf32>, vector<8x16xf32> -> vector<8x16xf32>
    %c0_8 = arith.constant 0 : index
    %c0_9 = arith.constant 0 : index
    %9 = vector.load %arg5[%c0_8, %c0_9] : memref<1x16xf32, #tpu.memory_space<vmem>>, vector<1x16xf32>
    %10 = vector.broadcast %9 : vector<1x16xf32> to vector<8x16xf32>
    %11 = arith.addf %8, %10 : vector<8x16xf32>
    %12 = math.tanh %11 : vector<8x16xf32>
    %c0_10 = arith.constant 0 : index
    %c0_11 = arith.constant 0 : index
    %13 = vector.load %arg6[%c0_10, %c0_11] : memref<1x16xf32, #tpu.memory_space<vmem>>, vector<1x16xf32>
    %14 = vector.broadcast %13 : vector<1x16xf32> to vector<8x16xf32>
    %15 = arith.mulf %12, %14 : vector<8x16xf32>
    %cst_12 = arith.constant dense<0.000000e+00> : vector<8xf32>
    %16 = vector.multi_reduction <add>, %15, %cst_12 [1] : vector<8x16xf32> to vector<8xf32>
    %17 = vector.shape_cast %16 : vector<8xf32> to vector<8x1xf32>
    %c0_13 = arith.constant 0 : index
    %c0_14 = arith.constant 0 : index
    %18 = memref.load %arg7[%c0_13, %c0_14] : memref<1x1xf32, #tpu.memory_space<smem>>
    %19 = vector.broadcast %18 : f32 to vector<8x1xf32>
    %20 = arith.addf %17, %19 : vector<8x1xf32>
    %21 = tpu.iota {dimensions = array<i32: 0>} : vector<8x1xi32>
    %c8_i32 = arith.constant 8 : i32
    %22 = arith.muli %arg1, %c8_i32 : i32
    %23 = vector.broadcast %22 : i32 to vector<8x1xi32>
    %24 = arith.addi %21, %23 : vector<8x1xi32>
    %cst_15 = arith.constant 0.000000e+00 : f32
    %25 = vector.broadcast %cst_15 : f32 to vector<8x1xf32>
    %26 = arith.cmpf ogt, %6, %25 : vector<8x1xf32>
    %cst_16 = arith.constant -1.000000e+30 : f32
    %27 = vector.broadcast %cst_16 : f32 to vector<8x1xf32>
    %28 = arith.select %26, %20, %27 : vector<8x1xi1>, vector<8x1xf32>
    %c24_i32 = arith.constant 24 : i32
    %29 = vector.broadcast %c24_i32 : i32 to vector<8x1xi32>
    %30 = arith.cmpi slt, %24, %29 : vector<8x1xi32>
    %cst_17 = arith.constant 0xFF800000 : f32
    %31 = vector.broadcast %cst_17 : f32 to vector<8x1xf32>
    %32 = arith.select %30, %28, %31 : vector<8x1xi1>, vector<8x1xf32>
    %c0_18 = arith.constant 0 : index
    %c0_19 = arith.constant 0 : index
    %33 = vector.load %arg12[%c0_18, %c0_19] : memref<1x1xf32, #tpu.memory_space<vmem>>, vector<1x1xf32>
    %cst_20 = arith.constant dense<0xFF800000> : vector<1xf32>
    %34 = vector.multi_reduction <maximumf>, %32, %cst_20 [0] : vector<8x1xf32> to vector<1xf32>
    %35 = vector.shape_cast %34 : vector<1xf32> to vector<1x1xf32>
    %36 = arith.maximumf %33, %35 : vector<1x1xf32>
    %37 = arith.subf %33, %36 : vector<1x1xf32>
    %38 = math.exp %37 : vector<1x1xf32>
    %39 = vector.broadcast %36 : vector<1x1xf32> to vector<8x1xf32>
    %40 = arith.subf %32, %39 : vector<8x1xf32>
    %41 = math.exp %40 : vector<8x1xf32>
    %c0_21 = arith.constant 0 : index
    %c0_22 = arith.constant 0 : index
    %42 = vector.load %arg13[%c0_21, %c0_22] : memref<1x1xf32, #tpu.memory_space<vmem>>, vector<1x1xf32>
    %43 = arith.mulf %38, %42 : vector<1x1xf32>
    %cst_23 = arith.constant dense<0.000000e+00> : vector<1xf32>
    %44 = vector.multi_reduction <add>, %41, %cst_23 [0] : vector<8x1xf32> to vector<1xf32>
    %45 = vector.shape_cast %44 : vector<1xf32> to vector<1x1xf32>
    %46 = arith.addf %43, %45 : vector<1x1xf32>
    %c0_24 = arith.constant 0 : index
    %c0_25 = arith.constant 0 : index
    %47 = vector.load %arg13[%c0_24, %c0_25] : memref<1x1xf32, #tpu.memory_space<vmem>>, vector<1x1xf32>
    tpu.vector_store %arg13[%c0_24, %c0_25], %46 {strides = array<i32>} : memref<1x1xf32, #tpu.memory_space<vmem>>, vector<1x1xf32>,
    %cst_26 = arith.constant dense<0.000000e+00> : vector<1x32xf32>
    %48 = tpu.matmul %41, %4, %cst_26 {dimension_numbers = #tpu.dot_dimension_numbers<[0], [0], [1], [1], [0, 1, 1, 1], [], []>} : vector<8x1xf32>, vector<8x32xf32>, vector<1x32xf32> -> vector<1x32xf32>
    %c0_27 = arith.constant 0 : index
    %c0_28 = arith.constant 0 : index
    %49 = vector.load %arg14[%c0_27, %c0_28] : memref<1x32xf32, #tpu.memory_space<vmem>>, vector<1x32xf32>
    %50 = vector.broadcast %38 : vector<1x1xf32> to vector<1x32xf32>
    %51 = arith.mulf %50, %49 : vector<1x32xf32>
    %52 = arith.addf %51, %48 : vector<1x32xf32>
    %c0_29 = arith.constant 0 : index
    %c0_30 = arith.constant 0 : index
    %53 = vector.load %arg14[%c0_29, %c0_30] : memref<1x32xf32, #tpu.memory_space<vmem>>, vector<1x32xf32>
    tpu.vector_store %arg14[%c0_29, %c0_30], %52 {strides = array<i32>} : memref<1x32xf32, #tpu.memory_space<vmem>>, vector<1x32xf32>,
    %c0_31 = arith.constant 0 : index
    %c0_32 = arith.constant 0 : index
    %54 = vector.load %arg12[%c0_31, %c0_32] : memref<1x1xf32, #tpu.memory_space<vmem>>, vector<1x1xf32>
    tpu.vector_store %arg12[%c0_31, %c0_32], %36 {strides = array<i32>} : memref<1x1xf32, #tpu.memory_space<vmem>>, vector<1x1xf32>,
    %c2_i32 = arith.constant 2 : i32
    %55 = arith.cmpi eq, %arg1, %c2_i32 : i32
    %56 = arith.extui %55 : i1 to i32
    %c0_i32_33 = arith.constant 0 : i32
    %57 = arith.cmpi ne, %56, %c0_i32_33 : i32
    scf.if %57 {
      %c0_34 = arith.constant 0 : index
      %c0_35 = arith.constant 0 : index
      %58 = vector.load %arg13[%c0_34, %c0_35] : memref<1x1xf32, #tpu.memory_space<vmem>>, vector<1x1xf32>
      %59 = tpu.reciprocal %58 {approx = true} : vector<1x1xf32> -> vector<1x1xf32>
      %c0_36 = arith.constant 0 : index
      %c0_37 = arith.constant 0 : index
      %60 = vector.load %arg14[%c0_36, %c0_37] : memref<1x32xf32, #tpu.memory_space<vmem>>, vector<1x32xf32>
      %61 = vector.broadcast %59 : vector<1x1xf32> to vector<1x32xf32>
      %62 = arith.mulf %60, %61 : vector<1x32xf32>
      %c0_38 = arith.constant 0 : index
      %c0_39 = arith.constant 0 : index
      %63 = vector.load %arg8[%c0_38, %c0_39] : memref<32x4xf32, #tpu.memory_space<vmem>>, vector<32x4xf32>
      %cst_40 = arith.constant dense<0.000000e+00> : vector<1x4xf32>
      %64 = tpu.matmul %62, %63, %cst_40 {dimension_numbers = #tpu.dot_dimension_numbers<[1], [0], [0], [1], [0, 0, 1, 1], [], []>} : vector<1x32xf32>, vector<32x4xf32>, vector<1x4xf32> -> vector<1x4xf32>
      %c0_41 = arith.constant 0 : index
      %c0_42 = arith.constant 0 : index
      %65 = vector.load %arg9[%c0_41, %c0_42] : memref<1x4xf32, #tpu.memory_space<vmem>>, vector<1x4xf32>
      %66 = arith.addf %64, %65 : vector<1x4xf32>
      %cst_43 = arith.constant 2.000000e+00 : f32
      %67 = vector.broadcast %cst_43 : f32 to vector<1x4xf32>
      %68 = arith.mulf %66, %67 : vector<1x4xf32>
      %cst_44 = arith.constant dense<0xFF800000> : vector<1xf32>
      %69 = vector.multi_reduction <maximumf>, %68, %cst_44 [1] : vector<1x4xf32> to vector<1xf32>
      %70 = vector.shape_cast %69 : vector<1xf32> to vector<1x1xf32>
      %71 = vector.broadcast %70 : vector<1x1xf32> to vector<1x4xf32>
      %72 = arith.subf %68, %71 : vector<1x4xf32>
      %73 = math.exp %72 : vector<1x4xf32>
      %cst_45 = arith.constant dense<0.000000e+00> : vector<1xf32>
      %74 = vector.multi_reduction <add>, %73, %cst_45 [1] : vector<1x4xf32> to vector<1xf32>
      %75 = vector.shape_cast %74 : vector<1xf32> to vector<1x1xf32>
      %76 = vector.broadcast %75 : vector<1x1xf32> to vector<1x4xf32>
      %77 = arith.divf %73, %76 : vector<1x4xf32>
      %c0_46 = arith.constant 0 : index
      %c0_47 = arith.constant 0 : index
      %c0_48 = arith.constant 0 : index
      %78 = vector.load %arg11[%c0_46, %c0_47, %c0_48] : memref<1x1x4xf32, #tpu.memory_space<vmem>>, vector<1x1x4xf32>
      %79 = vector.shape_cast %78 : vector<1x1x4xf32> to vector<1x4xf32>
      %80 = vector.shape_cast %66 : vector<1x4xf32> to vector<1x1x4xf32>
      tpu.vector_store %arg11[%c0_46, %c0_47, %c0_48], %80 {strides = array<i32>} : memref<1x1x4xf32, #tpu.memory_space<vmem>>, vector<1x1x4xf32>,
      %c0_49 = arith.constant 0 : index
      %c0_50 = arith.constant 0 : index
      %c0_51 = arith.constant 0 : index
      %81 = vector.load %arg10[%c0_49, %c0_50, %c0_51] : memref<1x1x4xf32, #tpu.memory_space<vmem>>, vector<1x1x4xf32>
      %82 = vector.shape_cast %81 : vector<1x1x4xf32> to vector<1x4xf32>
      %83 = vector.shape_cast %77 : vector<1x4xf32> to vector<1x1x4xf32>
      tpu.vector_store %arg10[%c0_49, %c0_50, %c0_51], %83 {strides = array<i32>} : memref<1x1x4xf32, #tpu.memory_space<vmem>>, vector<1x1x4xf32>,
    } else {
    }
    return
  }
  func.func @transform_0(%arg0: i32, %arg1: i32) -> (i32, i32, i32) {
    %c0_i32 = arith.constant 0 : i32
    %c0_i32_0 = arith.constant 0 : i32
    return %arg0, %arg1, %c0_i32 : i32, i32, i32
  }
  func.func @transform_1(%arg0: i32, %arg1: i32) -> (i32, i32, i32) {
    %c0_i32 = arith.constant 0 : i32
    %c0_i32_0 = arith.constant 0 : i32
    return %arg0, %arg1, %c0_i32 : i32, i32, i32
  }
  func.func @transform_2(%arg0: i32, %arg1: i32) -> (i32, i32) {
    %c0_i32 = arith.constant 0 : i32
    %c0_i32_0 = arith.constant 0 : i32
    %c0_i32_1 = arith.constant 0 : i32
    return %c0_i32, %c0_i32_0 : i32, i32
  }
  func.func @transform_3(%arg0: i32, %arg1: i32) -> (i32, i32) {
    %c0_i32 = arith.constant 0 : i32
    %c0_i32_0 = arith.constant 0 : i32
    %c0_i32_1 = arith.constant 0 : i32
    return %c0_i32, %c0_i32_0 : i32, i32
  }
  func.func @transform_4(%arg0: i32, %arg1: i32) -> (i32, i32) {
    %c0_i32 = arith.constant 0 : i32
    %c0_i32_0 = arith.constant 0 : i32
    %c0_i32_1 = arith.constant 0 : i32
    return %c0_i32, %c0_i32_0 : i32, i32
  }
  func.func @transform_5(%arg0: i32, %arg1: i32) -> (i32, i32) {
    %c0_i32 = arith.constant 0 : i32
    %c0_i32_0 = arith.constant 0 : i32
    %c0_i32_1 = arith.constant 0 : i32
    return %c0_i32, %c0_i32_0 : i32, i32
  }
  func.func @transform_6(%arg0: i32, %arg1: i32) -> (i32, i32) {
    %c0_i32 = arith.constant 0 : i32
    %c0_i32_0 = arith.constant 0 : i32
    %c0_i32_1 = arith.constant 0 : i32
    return %c0_i32, %c0_i32_0 : i32, i32
  }
  func.func @transform_7(%arg0: i32, %arg1: i32) -> (i32, i32) {
    %c0_i32 = arith.constant 0 : i32
    %c0_i32_0 = arith.constant 0 : i32
    %c0_i32_1 = arith.constant 0 : i32
    return %c0_i32, %c0_i32_0 : i32, i32
  }
  func.func @transform_8(%arg0: i32, %arg1: i32) -> (i32, i32, i32) {
    %c0_i32 = arith.constant 0 : i32
    %c0_i32_0 = arith.constant 0 : i32
    %c0_i32_1 = arith.constant 0 : i32
    return %arg0, %c0_i32, %c0_i32_0 : i32, i32, i32
  }
  func.func @transform_9(%arg0: i32, %arg1: i32) -> (i32, i32, i32) {
    %c0_i32 = arith.constant 0 : i32
    %c0_i32_0 = arith.constant 0 : i32
    %c0_i32_1 = arith.constant 0 : i32
    return %arg0, %c0_i32, %c0_i32_0 : i32, i32, i32
  }
}

</mosaic_0001>

<bundles_post_ra>
// kernel: tpu_custom_call.1
= control target key start
LH: loop header
LB: loop body
LE: loop exit
PB: predicated region body
PF: predicated region fallthrough
CT: control target
= control target key end

     0   :  { %s1519_s0 = inlined_call_operand.vmem [shape: f32[2,24,32], index: 0, kind: input, shape index: {}]   ;;  %s1520_s1 = inlined_call_operand.vmem [shape: f32[2,24,1], index: 1, kind: input, shape index: {}]   ;;  %s1521_s2 = inlined_call_operand.vmem [shape: f32[32,16], index: 2, kind: input, shape index: {}]   ;;  %s1522_s3 = inlined_call_operand.vmem [shape: f32[1,16], index: 3, kind: input, shape index: {}]   ;;  %s1523_s4 = inlined_call_operand.vmem [shape: f32[1,16], index: 4, kind: input, shape index: {}]   ;;  %s1524_s5 = inlined_call_operand.<no memory space> [shape: f32[1,1], index: 5, kind: input, shape index: {}]   ;;  %s1525_s6 = inlined_call_operand.vmem [shape: f32[32,4], index: 6, kind: input, shape index: {}]   ;;  %s1526_s7 = inlined_call_operand.vmem [shape: f32[1,4], index: 7, kind: input, shape index: {}]   ;;  %s1527_s8 = inlined_call_operand.hbm [shape: f32[2,1,4], index: 8, kind: output, shape index: {0}]   ;;  %s1528_s9 = inlined_call_operand.hbm [shape: f32[2,1,4], index: 9, kind: output, shape index: {1}]  }
   0x1   :  { %15 = sst [smem:[#allocation5]] %s1524_s5 }
   0x2   :  { %16 = vsyncpa [#allocation7], 0 }
   0x3   :  { %18 = vsyncpa [#allocation7 + $0x1], 0 }
   0x4   :  { %19 = vsyncpa [#allocation9], 0 }
   0x5   :  { %21 = vsyncpa [#allocation9 + $0x1], 0  ;;  %s1294_s11 = smov 0   ;;  %s1296_s12 = smov 0  }
   0x6   :  { %s1298_s13 = smov 0   ;;  %s1300_s14 = smov 0  }
   0x7   :  { %s1302_s15 = smov 0   ;;  %s1304_s16 = smov 0  }
   0x8   :  { %s1306_s17 = smov 0   ;;  %s1308_s18 = smov 0  }
   0x9 LB: > { %1532 = sst [smem:[#allocation12_spill]] %s1219_s16  ;;  %s929_s5 = sadd.s32 4294967295, %s1227_s18   ;;  %s1227_s18 = sphi %s1308_s18, %s27_s18   ;;  %s1223_s17 = sphi %s1306_s17, %s1543_s17   ;;  %s1219_s16 = sphi %s1304_s16, %s1542_s16   ;;  %s1215_s15 = sphi %s1302_s15, %s1541_s15   ;;  %s1211_s14 = sphi %s1300_s14, %s1540_s14   ;;  %s1207_s13 = sphi %s1298_s13, %s1546_s13   ;;  %s1203_s12 = sphi %s1296_s12, %s1545_s12   ;;  %s1199_s11 = sphi %s1294_s11, %s1544_s11  }
   0xa   : > { %1533 = sst [smem:[#allocation13_spill]] %s1223_s17  ;;  %s930_s19 = sadd.s32 4294967294, %s1227_s18  }
   0xb   : > { %s36_s20 = sadd.s32 1, %s1219_s16  ;;  %s39_s21 = sadd.s32 1, %s1223_s17 }
   0xc   : > { %p37_p0 = scmp.ge.s32.totalorder %s36_s20, 3  ;;  %p238_p1 = scmp.ne.s32.totalorder %s1207_s13, %s1203_s12 }
   0xd   : > { %p239_p2 = scmp.eq.s32.totalorder %s929_s5, 5  ;;  %p244_p4 = scmp.ne.s32.totalorder %s1203_s12, %s1199_s11 }
   0xe   : > { %s1548_s20 = smov (%p37_p0, %s36_s20), 0  ;;  %s1550_s21 = smov (!%p37_p0, %s39_s21), %s1223_s17 }
   0xf   : > { %1534 = sst [smem:[#allocation14_spill]] %s1548_s20  ;;  %p1343_p3 = por %p239_p2, %p238_p1 }
  0x10   : > { %p41_p5 = scmp.ge.s32.totalorder %s1550_s21, 2  ;;  %p245_p6 = scmp.eq.s32.totalorder %s930_s19, 5 }
  0x11   : > { %p933_p7 = scmp.ge.s32.totalorder %s1227_s18, 1  ;;  %p329_p8 = scmp.lt.s32.totalorder %s1227_s18, 7 }
  0x12   : > { %s1552_s21 = smov (%p41_p5, %s1550_s21), 0  ;;  %p1353_p9 = por %p245_p6, %p244_p4 }
  0x13   : > { %1536 = sst [smem:[#allocation15_spill]] %s1552_s21  ;;  %p330_p10 = pnand %p933_p7, %p329_p8 }
  0x14   : > { %s225_s24 = ssub.s32 %s1223_s17, %s1552_s21  ;;  %s228_s25 = sadd.s32 1, %s1207_s13 }
  0x15   : > { %p226_p11 = scmp.eq.s32.totalorder %s225_s24, 0  ;;  %333 = sbr.rel (%p330_p10) target bundleno = 1386 (0x56a), region = 52 }
  0x16   : > { %s1364_s27 = sand.u32 (!%p330_p10), 1, %s1203_s12   ;;  %p379_p12 = scmp.lt.s32.totalorder (!%p330_p10), %s1215_s15, 1 }
  0x17   : > { %s1361_s26 = scalar_select %p226_p11, %s1207_s13, %s228_s25  }
  0x18   : > { %p381_p13 = scmp.lt.s32.totalorder (!%p330_p10), %s1211_s14, 2  ;;  %s372_s16 = scalar_lea.vmem (!%p330_p10), [#allocation6], %s1364_s27 }
  0x19   : > { %1538 = sst [smem:[#allocation16_spill]] %s1361_s26  ;;  %s378_s26 = scalar_lea.vmem (!%p330_p10), [#allocation8], %s1364_s27 }
  0x1a   : > { %p936_p0 = scmp.ne.s32.totalorder (!%p330_p10), %s1211_s14, 0 }
  0x1c   : > { %s380_s28 = scalar_select %p379_p12, %s1215_s15, 1 }
  0x1d   : > { %s382_s30 = scalar_select %p381_p13, %s1211_s14, 2 }
  0x1e   : > { %s999_s29 = smul.u32 3, %s380_s28  ;;  %vm399_vm0 = vcmask (!%p936_p0), 0   ;;  %vm402_vm1 = vcmask (!%p936_p0), 253952   ;;  %v1229_v0 = vmov (!%p936_p0), -1e+30   ;;  %v1230_v1 = vmov (!%p936_p0), 0.0  }
  0x1f   : > { %398 = sbr.rel (%p936_p0) target bundleno = 38 (0x26), region = 56  ;;  %400 = vst.msk [vmem:[#allocation2] sm:$0x1] (!%p936_p0), %vm399_vm0, %v1229_v0  ;;  %401 = vst.msk [vmem:[#allocation3] sm:$0x1] (!%p936_p0), %vm399_vm0, %v1230_v1 }
  0x20   : > { %s384_s10 = sadd.s32 %s999_s29, %s382_s30  ;;  %403 = vst.msk [vmem:[#allocation4] sm:$0x1] (!%p936_p0), %vm402_vm1, %v1230_v1 }
  0x21   : > { %s934_s5 = sshll.u32 %s384_s10, 3 }
  0x22   : > { %s386_s25 = scalar_lea.vmem %s1519_s0, %s934_s5  ;;  %s1376_s17 = scalar_lea.vmem %s1520_s1, %s934_s5 }
  0x26 PF: > { %v406_v2 = vld [vmem:[%s1521_s2] sm:$0xff]  ;;  %v407_v3 = vld [vmem:[%s1521_s2 + $0x8] sm:$0xff]  ;;  %v408_v4 = vld [vmem:[%s1521_s2 + $0x10] sm:$0xff]  ;;  %v1231_v5 = vmov 0.0|0.0   ;;  %vm1232_vm2 = vmmov 0   ;;  %v1233_v8 = vmov 0.0   ;;  %v507_v20 = vlaneseq }
  0x27   : > { %987 = vmatprep.subr.bf16.mxu0 %v1231_v5  ;;  %v988_v6 = vpack.c.bf16 %v407_v3, %v406_v2  ;;  %v409_v7 = vld [vmem:[%s1521_s2 + $0x18] sm:$0xff]  ;;  %968 = vmatprep.mubr.msk.f32.mxu0 %vm1232_vm2, %v1233_v8  ;;  %v404_v9 = vld [vmem:[%s386_s25] sm:$0xff]  ;;  %vm417_vm3 = vcmask 261120   ;;  %vm500_vm4 = vcmask 130048   ;;  %v1234_v19 = vmov 0   ;;  %s504_s20 = sld [smem:[#allocation5]] }
  0x28   : > { %971 = vmatprep.subr.mxu1 %v1233_v8  ;;  %973 = vmatprep.mubr.msk.f32.mxu1 %vm1232_vm2, %v1233_v8  ;;  %v991_v10 = vpack.c.bf16 %v409_v7, %v408_v4  ;;  %v937_v11 = vld [vmem:[%s1522_s3] ss:$0 sm:$0xff]  ;;  %s940_s21 = sshll.u32 %s1211_s14, 3  ;;  %v508_v21 = vshrl.u32 %v507_v20, 7  ;;  %vm517_vm7 = vcmask 7168   ;;  %vm548_vm8 = vcmask 0  }
  0x29   : > { %989 = vmatpush3.bf16.msra.mxu0 %v988_v6  ;;  %972 = vmatpush3.msra.mxu1 %v404_v9  ;;  %v939_v15 = vld [vmem:[%s1523_s4] ss:$0 sm:$0xff]  ;;  %v510_v22 = vstv %s940_s21  ;;  %v538_v52 = vld [vmem:[#allocation3] sm:$0x1]  ;;  %vm582_vm9 = vcmask 64512   ;;  %vm668_vm10 = vcmask 253952  }
  0x2a   : > { %990 = vmatprep.subr.bf16.mxu0 %v1231_v5  ;;  %1086 = vset.pattern.permute.xlu1 %v1234_v19  ;;  %v405_v23 = vld [vmem:[%s1376_s17] sm:$0xff]  ;;  %v511_v24 = vadd.s32 %v510_v22, %v508_v21  ;;  %v1403_v37 = vsub.s32 0, %v508_v21  ;;  %p942_p1 = scmp.ne.s32.totalorder %s1211_s14, 2 }
  0x2b   : > { %vm512_vm5 = vcmp.gt.f32.partialorder %v405_v23, 0.0  ;;  %v516_v36 = vld [vmem:[#allocation2] sm:$0x1]  ;;  %v656_v60 = vld [vmem:[#allocation4] sm:$0x1]  ;;  %v689_v3 = vld [vmem:[%s1525_s6 + $0x8] sm:$0xff] (!%p942_p1) }
  0x2c   : > { %vm514_vm6 = vcmp.lt.s32.totalorder %v511_v24, 24  ;;  %v688_v2 = vld [vmem:[%s1525_s6] sm:$0xff] (!%p942_p1)  ;;  %v1235_v4 = vmov (!%p942_p1), 0   ;;  %v1236_v5 = vmov (!%p942_p1), 0.0|0.0   ;;  %v690_v7 = vld [vmem:[%s1525_s6 + $0x10] sm:$0xff] (!%p942_p1)  ;;  %v691_v8 = vld [vmem:[%s1525_s6 + $0x18] sm:$0xff] (!%p942_p1) }
  0x2d   : > { %992 = vmatpush3.bf16.msra.mxu0 %v991_v10  ;;  %v505_v25 = vstv %s504_s20  ;;  %v994_v6 = vpack.c.bf16 (!%p942_p1), %v689_v3, %v688_v2  ;;  %v997_v10 = vpack.c.bf16 (!%p942_p1), %v691_v8, %v690_v7  ;;  %vm1237_vm11 = vmmov (!%p942_p1), 0  }
  0x2e   : > { %993 = vmatprep.subr.bf16.mxu0 (!%p942_p1), %v1236_v5  ;;  %vm767_vm12 = vcmask (!%p942_p1), 24576  }
  0x30   : > { %969 = vmatmul.mubr.msk.f32.vlgmr.msra.gmra.mrb[0].mxu0 %vm417_vm3, %v404_v9 }
  0x31   : > { %995 = vmatpush3.bf16.msra.mxu0 (!%p942_p1), %v994_v6 }
  0x32   : > { %996 = vmatprep.subr.bf16.mxu0 (!%p942_p1), %v1236_v5 }
  0x35   : > { %998 = vmatpush3.bf16.msra.mxu0 (!%p942_p1), %v997_v10 }
 0x103   : > { %v487_v12 = vpop.f32.mrb[0].mxu0 }
 0x104   : > { %v488_v13 = vadd.f32 %v937_v11, %v487_v12  ;;  %v970_v14 = vpop.f32.mrb[1].mxu0  ;;  %v1238_v11 = vmov (!%p942_p1), 0.0  }
 0x105   : > { %984 = vmatprep.mubr.msk.f32.mxu0 (!%p942_p1), %vm1237_vm11, %v1238_v11 }
 0x106   : > { %1088 = vtanh.f32 %v488_v13 }
 0x110   : > { %v1089_v16 = vpop.eup %1088 }
 0x111   : > { %v499_v17 = vmul.f32 %v1089_v16, %v939_v15  ;;  %v692_v16 = vld [vmem:[%s1526_s7] sm:$0x1] (!%p942_p1) }
 0x113   : > { %v501_v18 = vsel %vm500_vm4, %v499_v17, 0.0 }
 0x114   : > { %502 = vadd.xlane.f32.xlu0 %v501_v18 }
 0x1a1   : > { %v503_v26 = vpop.xlane.xlu0 %502 }
 0x1a2   : > { %v506_v27 = vadd.f32 %v505_v25, %v503_v26 }
 0x1a4   : > { %v513_v28 = vsel %vm512_vm5, %v506_v27, -1e+30 }
 0x1a5   : > { %v515_v29 = vsel %vm514_vm6, %v513_v28, -inf }
 0x1a6   : > { %v518_v30 = vsel %vm517_vm7, %v515_v29, -inf }
 0x1a7   : > { %v519_v31 = vrot.slane %v518_v30, 4 }
 0x1a9   : > { %v520_v32 = vmax.f32 %v518_v30, %v519_v31 }
 0x1ab   : > { %v521_v33 = vrot.slane %v520_v32, 2 }
 0x1ad   : > { %v522_v34 = vmax.f32 %v520_v32, %v521_v33 }
 0x1af   : > { %v523_v35 = vrot.slane %v522_v34, 1 }
 0x1b1   : > { %v524_v38 = vmax.f32 %v522_v34, %v523_v35 }
 0x1b3   : > { %v525_v39 = vmax.f32 %v516_v36, %v524_v38 }
 0x1b5   : > { %v533_v40 = vrot.slane %v525_v39, %v1403_v37  ;;  %670 = vst.msk [vmem:[#allocation2] sm:$0x1] %vm548_vm8, %v525_v39  ;;  %v526_v41 = vsub.f32 %v516_v36, %v525_v39 }
 0x1b7   : > { %v535_v42 = vsub.f32 %v515_v29, %v533_v40  ;;  %v527_v43 = vmul.f32 1.442695, %v526_v41 }
 0x1b9   : > { %v536_v44 = vmul.f32 1.442695, %v535_v42  ;;  %1090 = vpow2.f32 %v527_v43 }
 0x1bb   : > { %1092 = vpow2.f32 %v536_v44 }
 0x1c3   : > { %v1091_v45 = vpop.eup %1090 }
 0x1c4   : > { %659 = vperm.xlu1 %1086, %v1091_v45   ;;  %v539_v55 = vmul.f32 %v1091_v45, %v538_v52 }
 0x1c5   : > { %v1093_v46 = vpop.eup %1092 }
 0x1c6   : > { %v540_v47 = vsel %vm517_vm7, %v1093_v46, 0.0  ;;  %550 = vxpose.xlu0.b32.start.end [1/1] (short) (narrow) %v1093_v46, 8 }
 0x1c7   : > { %v541_v48 = vrot.slane %v540_v47, 4 }
 0x1c9   : > { %v542_v49 = vadd.f32 %v541_v48, %v540_v47 }
 0x1cb   : > { %v543_v50 = vrot.slane %v542_v49, 2 }
 0x1cd   : > { %v544_v51 = vadd.f32 %v543_v50, %v542_v49 }
 0x1cf   : > { %v545_v53 = vrot.slane %v544_v51, 1 }
 0x1d1   : > { %v546_v54 = vadd.f32 %v545_v53, %v544_v51 }
 0x1d3   : > { %v547_v56 = vadd.f32 %v546_v54, %v539_v55 }
 0x1d5   : > { %549 = vst.msk [vmem:[#allocation3] sm:$0x1] %vm548_vm8, %v547_v56 }
 0x1dc   : > { %v675_v1 = vld [vmem:[#allocation3] sm:$0x1] (!%p942_p1) }
 0x1dd   : > { %1095 = vrcp.f32 (!%p942_p1), %v675_v1 }
 0x1e7   : > { %v1096_v9 = vpop.eup (!%p942_p1), %1095 }
 0x1ef   : > { %1087 = vset.pattern.permute.xlu0 %v1234_v19 }
 0x1f0   : > { %1094 = vset.pattern.permute.xlu0 (!%p942_p1), %v1235_v4 }
 0x1f1   : > { %680 = vperm.xlu0 (!%p942_p1), %1094, %v1096_v9  }
 0x243   : > { %v660_v58 = vpop.permute.xlu1 %659 }
 0x244   : > { %v665_v59 = vrot.slane %v660_v58, %v1403_v37 }
 0x246   : > { %v566_v57 = vpop.trf.xlu0  ;;  %v666_v61 = vmul.f32 %v665_v59, %v656_v60 }
 0x247   : > { %974 = vmatmul.mubr.msk.f32.vlgmr.msra.gmra.mrb[0].mxu1 %vm582_vm9, %v566_v57 }
 0x270   : > { %v681_v13 = vpop.permute.xlu0 (!%p942_p1), %680 }
 0x271   : > { %v686_v14 = vrot.slane (!%p942_p1), %v681_v13, %v1403_v37 }
 0x317   : > { %674 = sbr.rel (%p942_p1) target bundleno = 1338 (0x53a), region = 60 }
 0x31a   : > { %v652_v62 = vpop.f32.mrb[0].mxu1 }
 0x31b   : > { %v667_v63 = vadd.f32 %v666_v61, %v652_v62  ;;  %v975_v0 = vpop.f32.mrb[1].mxu1 }
 0x31d   : > { %669 = vst.msk [vmem:[#allocation4] sm:$0x1] %vm668_vm10, %v667_v63 }
 0x324   : > { %v677_v12 = vld [vmem:[#allocation4] sm:$0x1] }
 0x325   : > { %v687_v15 = vmul.f32 %v686_v14, %v677_v12 }
 0x327   : > { %985 = vmatmul.mubr.msk.f32.vlgmr.msra.gmra.mrb[0].mxu0 %vm417_vm3, %v687_v15 }
 0x3fa   : > { %v762_v17 = vpop.f32.mrb[0].mxu0 }
 0x3fb   : > { %v763_v18 = vadd.f32 %v762_v17, %v692_v16  ;;  %v986_v19 = vpop.f32.mrb[1].mxu0 }
 0x3fd   : > { %779 = vst.msk [vmem:[%s378_s26] sm:$0x1] %vm767_vm12, %v763_v18  ;;  %v766_v20 = vmul.f32 2.0, %v763_v18 }
 0x3ff   : > { %v768_v21 = vsel %vm767_vm12, %v766_v20, -inf }
 0x400   : > { %769 = vmax.xlane.f32.xlu0 %v768_v21 }
 0x48d   : > { %v770_v22 = vpop.xlane.xlu0 %769 }
 0x48e   : > { %v771_v23 = vsub.f32 %v766_v20, %v770_v22 }
 0x490   : > { %v772_v24 = vmul.f32 1.442695, %v771_v23 }
 0x492   : > { %1097 = vpow2.f32 %v772_v24 }
 0x49c   : > { %v1098_v25 = vpop.eup %1097 }
 0x49d   : > { %v774_v26 = vsel %vm767_vm12, %v1098_v25, 0.0 }
 0x49e   : > { %775 = vadd.xlane.f32.xlu1 %v774_v26 }
 0x52b   : > { %v776_v27 = vpop.xlane.xlu1 %775 }
 0x52c   : > { %1099 = vrcp.f32 %v776_v27 }
 0x536   : > { %v1100_v28 = vpop.eup %1099 }
 0x537   : > { %v778_v29 = vmul.f32 %v1100_v28, %v1098_v25 }
 0x539   : > { %780 = vst.msk [vmem:[%s372_s16] sm:$0x1] %vm767_vm12, %v778_v29 }
 0x53a PF: > { %s944_s20 = sshll.u32 %s1215_s15, 4  ;;  %s798_s10 = sshll.u32 %s372_s16, 4  ;;  %s799_s10 = int_to_ptr.vmem [resolvable:$true] %s798_s10 }
 0x53b   : > { %s1442_s30 = scalar_lea.hbm %s1527_s8, %s944_s20  ;;  %s782_s5 = scalar_lea.sflag [#allocation7], %s1364_s27 }
 0x53c   : > { %s1101_s19 = scalar_lea.vmem %s799_s10, 16  ;;  %s1239_s14 = smov [#allocation6]  }
 0x53d   : > { %p1102_p2 = scmp.ne.s32.totalorder %s799_s10, %s1101_s19  ;;  %s1105_s24 = sshll.u32 %s1239_s14, 4  ;;  %s1106_s24 = int_to_ptr.vmem [resolvable:$false] %s1105_s24 }
 0x53e   : > { %s1107_s28 = scalar_lea.vmem %s1106_s24, 32  ;;  %p1108_p6 = scmp.lt.s32.totalorder %s799_s10, %s1106_s24 }
 0x53f   : > { %p1103_p4 = pnand %p1102_p2, %p1343_p3  ;;  %p1109_p7 = scmp.lt.s32.totalorder %s1107_s28, %s1101_s19 }
 0x541   : > { %p1104_p5 = pneg %p1103_p4  ;;  %p1110_p8 = por %p1109_p7, %p1108_p6 }
 0x543   : > { %p1111_p10 = pnand %p1110_p8, %p1104_p5 }
 0x545   : > { %1114 = shalt.err (!%p1111_p10)
}
 0x546   : > { %s1115_s16 = scalar_lea.hbm %s1442_s30, 16  ;;  %s1119_s21 = scalar_lea.hbm %s1527_s8, 32 }
 0x547   : > { %p1116_p11 = scmp.ne.s32.totalorder %s1442_s30, %s1115_s16  ;;  %p1120_p0 = scmp.lt.u32.totalorder %s1442_s30, %s1527_s8 }
 0x548   : > { %p1121_p1 = scmp.lt.u32.totalorder %s1119_s21, %s1115_s16  ;;  %p1123_p4 = scmp.lt.u32.totalorder %s1115_s16, %s1442_s30 }
 0x549   : > { %p1117_p12 = pnand %p1116_p11, %p1343_p3 }
 0x54a   : > { %p1122_p2 = por %p1121_p1, %p1120_p0 }
 0x54b   : > { %p1118_p13 = pneg %p1117_p12 }
 0x54c   : > { %p1124_p5 = por %p1123_p4, %p1122_p2 }
 0x54e   : > { %p1125_p6 = pnand %p1124_p5, %p1118_p13 }
 0x550   : > { %1128 = shalt.err (!%p1125_p6)
}
 0x551   : > { %1000 = dma.vmem_to_hbm [thread:$0]  (%p1343_p3), %s799_s10, 16, %s1442_s30, %s782_s5  }
 0x552   : > { %s1469_s28 = scalar_lea.hbm %s1528_s9, %s944_s20  ;;  %s811_s25 = sshll.u32 %s378_s26, 4  ;;  %s812_s25 = int_to_ptr.vmem [resolvable:$true] %s811_s25 }
 0x553   : > { %s786_s16 = scalar_lea.sflag [#allocation9], %s1364_s27  ;;  %s1129_s29 = scalar_lea.vmem %s812_s25, 16 }
 0x554   : > { %p1130_p7 = scmp.ne.s32.totalorder %s812_s25, %s1129_s29  ;;  %s1240_s21 = smov [#allocation8]  }
 0x555   : > { %s1133_s17 = sshll.u32 %s1240_s21, 4  ;;  %s1134_s17 = int_to_ptr.vmem [resolvable:$false] %s1133_s17 }
 0x556   : > { %p1131_p8 = pnand %p1130_p7, %p1343_p3  ;;  %s1135_s14 = scalar_lea.vmem %s1134_s17, 32 }
 0x557   : > { %p1136_p11 = scmp.lt.s32.totalorder %s812_s25, %s1134_s17  ;;  %p1137_p12 = scmp.lt.s32.totalorder %s1135_s14, %s1129_s29 }
 0x558   : > { %p1132_p10 = pneg %p1131_p8 }
 0x559   : > { %p1138_p13 = por %p1137_p12, %p1136_p11 }
 0x55b   : > { %p1139_p0 = pnand %p1138_p13, %p1132_p10 }
 0x55d   : > { %1142 = shalt.err (!%p1139_p0)
}
 0x55e   : > { %s1143_s15 = scalar_lea.hbm %s1469_s28, 16  ;;  %s1147_s20 = scalar_lea.hbm %s1528_s9, 32 }
 0x55f   : > { %p1144_p1 = scmp.ne.s32.totalorder %s1469_s28, %s1143_s15  ;;  %p1148_p5 = scmp.lt.u32.totalorder %s1469_s28, %s1528_s9 }
 0x560   : > { %p1149_p6 = scmp.lt.u32.totalorder %s1147_s20, %s1143_s15  ;;  %p1151_p8 = scmp.lt.u32.totalorder %s1143_s15, %s1469_s28 }
 0x561   : > { %p1145_p2 = pnand %p1144_p1, %p1343_p3 }
 0x562   : > { %p1150_p7 = por %p1149_p6, %p1148_p5 }
 0x563   : > { %p1146_p4 = pneg %p1145_p2 }
 0x564   : > { %p1152_p10 = por %p1151_p8, %p1150_p7 }
 0x566   : > { %p1153_p11 = pnand %p1152_p10, %p1146_p4 }
 0x568   : > { %1156 = shalt.err (!%p1153_p11)
}
 0x569   : > { %1001 = dma.vmem_to_hbm [thread:$0]  (%p1343_p3), %s812_s25, 16, %s1469_s28, %s786_s16  }
 0x56a PF: > { %p1011_p12 = scmp.ge.s32.totalorder %s1227_s18, 2  ;;  %s823_s5 = sand.u32 1, %s1199_s11  }
 0x56b   : > { %s824_s19 = scalar_lea.sflag [#allocation7], %s823_s5 }
 0x56c   : > { %p1005_p13 = pnand %p1011_p12, %p1353_p9 }
 0x56e   : > { %1190 = dma.done.wait (!%p1005_p13), %s824_s19, 16  }
 0x56f   : > { %1192 = vsyncadd (!%p1005_p13), %s824_s19, 4294967280  ;;  %s832_s24 = scalar_lea.sflag [#allocation9], %s823_s5 }
 0x570   : > { %1194 = dma.done.wait (!%p1005_p13), %s832_s24, 16  }
 0x571   : > { %1196 = vsyncadd (!%p1005_p13), %s832_s24, 4294967280  ;;  %s27_s18 = sadd.s32 1, %s1227_s18   ;;  %s1539_s22 = sld [smem:[#allocation16_spill]] }
 0x572   : > { %p24_p0 = scmp.ge.s32.totalorder %s27_s18, 8   ;;  %s1540_s14 = sld [smem:[#allocation12_spill]] }
 0x573   : > { %s1541_s15 = sld [smem:[#allocation13_spill]]  ;;  %s1542_s16 = sld [smem:[#allocation14_spill]] }
 0x574   : > { %s1543_s17 = sld [smem:[#allocation15_spill]]  ;;  %s1544_s11 = smov %s1203_s12 }
 0x575   : > { %s1545_s12 = smov %s1207_s13  ;;  %26 = sbr.rel (!%p24_p0) target bundleno = 9 (0x9), region = 115 }
 0x577   : > { %s1546_s13 = smov %s1539_s22 }
 0x57c   :  { %836 = vsyncpa [#allocation7], 1 }
 0x57d   :  { %838 = vsyncpa [#allocation7 + $0x1], 1 }
 0x57e   :  { %839 = vsyncpa [#allocation9], 1 }
 0x57f   :  { %841 = vsyncpa [#allocation9 + $0x1], 1 }

</bundles_post_ra>
